<compile_context>
chip_gen: v5e
topology: v5e:2x2
jax: 0.10.0
libtpu: 0.0.40
codegen_flags: <defaults>
</compile_context>

<pallas_src>
import math
import functools

import jax
import jax.numpy as jnp
from jax.experimental import pallas as pl
from jax.experimental.pallas import tpu as pltpu


_MAX_TK = 2048                         # largest single-K-step reduction size
_VMEM_LIMIT_BYTES = 32 * 1024 * 1024   # >= v5e 16MiB default, <= v7x 64MiB/TC


def _round_up(n, m):
    return -(-n // m) * m


# --------------------------------------------------------------------------
# Kernels
# --------------------------------------------------------------------------

def _noisy_linear_train_kernel(x_ref, wmu_ref, wsig_ref, ein_ref, eout_ref,
                               b_ref, o_ref):
    k = pl.program_id(2)

    @pl.when(k == 0)
    def _():
        # Initialise the resident f32 output block with the fused bias.
        o_ref[...] = jnp.zeros_like(o_ref) + b_ref[...]

    x = x_ref[...]                       # (tm, tk) f32
    wmu = wmu_ref[...]                   # (tk, tn)
    wsig = wsig_ref[...]                 # (tk, tn)
    xs = x * ein_ref[...]                # lane-dense (1, tk) broadcast on the VPU
    if x.dtype != wmu.dtype:             # opt-in bf16 weight streaming
        x = x.astype(wmu.dtype)
        xs = xs.astype(wmu.dtype)

    part = jnp.dot(x, wmu, preferred_element_type=jnp.float32)
    part = part + jnp.dot(xs, wsig,
                          preferred_element_type=jnp.float32) * eout_ref[...]
    o_ref[...] += part


def _noisy_linear_eval_kernel(x_ref, wmu_ref, b_ref, o_ref):
    k = pl.program_id(2)

    @pl.when(k == 0)
    def _():
        o_ref[...] = jnp.zeros_like(o_ref) + b_ref[...]

    x = x_ref[...]
    wmu = wmu_ref[...]
    if x.dtype != wmu.dtype:
        x = x.astype(wmu.dtype)
    o_ref[...] += jnp.dot(x, wmu, preferred_element_type=jnp.float32)


# --------------------------------------------------------------------------
# Tiling
# --------------------------------------------------------------------------

def _padded_dims(in_features, out_features):
    # Single K step (no in padding) up to _MAX_TK; otherwise pad to 128.
    in_p = in_features if in_features <= _MAX_TK else _round_up(in_features, 128)
    out_p = _round_up(out_features, 128)
    return in_p, out_p


def _pick_tiles(batch, in_p, out_p):
    if batch <= 128:
        tm = _round_up(max(batch, 1), 8)
        b_p = tm
    else:
        tm = 128
        b_p = _round_up(batch, 128)
    mb = b_p // tm

    tn = next(t for t in (512, 256, 128) if out_p % t == 0)
    if in_p <= _MAX_TK:
        tk = in_p
    else:
        tk = next(t for t in (2048, 1024, 512, 256, 128) if in_p % t == 0)
    kb = in_p // tk

    # v7x megacore: keep the parallel-block count even when it is cheap to do.
    nb = out_p // tn
    if (mb * nb) % 2 == 1 and tn >= 256:
        tn //= 2
        nb = out_p // tn
    return b_p, tm, mb, tn, nb, tk, kb


# --------------------------------------------------------------------------
# Forward
# --------------------------------------------------------------------------

@functools.partial(jax.jit, static_argnames=("out_features", "training"))
def _noisy_linear_impl(x, wmu, wsig, ein, eout, bias, *, out_features, training):
    batch, in_features = x.shape
    in_p, out_p = wmu.shape
    b_p, tm, mb, tn, nb, tk, kb = _pick_tiles(batch, in_p, out_p)

    x_p = x
    if (batch, in_features) != (b_p, in_p):
        x_p = jnp.pad(x, ((0, b_p - batch), (0, in_p - in_features)))

    # When the whole reduction fits one K step and there are several batch
    # blocks, iterate (j, i) with the weight index independent of i so each
    # (in_p, tn) weight panel stays resident across batch blocks.
    weights_resident = (mb > 1 and kb == 1)
    if weights_resident:
        grid = (nb, mb, kb)
        x_map = lambda j, i, k: (i, k)
        w_map = lambda j, i, k: (k, j)
        ein_map = lambda j, i, k: (0, k)
        row_map = lambda j, i, k: (0, j)
        o_map = lambda j, i, k: (i, j)
    else:
        grid = (mb, nb, kb)               # reduction axis last
        x_map = lambda i, j, k: (i, k)
        w_map = lambda i, j, k: (k, j)
        ein_map = lambda i, j, k: (0, k)
        row_map = lambda i, j, k: (0, j)
        o_map = lambda i, j, k: (i, j)

    x_spec = pl.BlockSpec((tm, tk), x_map)
    w_spec = pl.BlockSpec((tk, tn), w_map)
    row_spec = pl.BlockSpec((1, tn), row_map)
    out_spec = pl.BlockSpec((tm, tn), o_map)

    # Advisory cost estimate (weights re-streamed per batch block unless resident).
    w_bytes = jnp.dtype(wmu.dtype).itemsize
    n_w = 2 if training else 1
    w_streams = 1 if weights_resident else mb
    flops = 2 * b_p * in_p * out_p * n_w + 2 * b_p * out_p
    if training:
        flops += nb * b_p * in_p                          # x * eps_in per j block
    bytes_accessed = (n_w * in_p * out_p * w_bytes * w_streams
                      + 4 * b_p * in_p * nb + 4 * b_p * out_p
                      + 4 * (in_p + 3 * out_p))
    cost = pl.CostEstimate(flops=flops, transcendentals=0,
                           bytes_accessed=bytes_accessed)

    cparams = pltpu.CompilerParams(
        dimension_semantics=("parallel", "parallel", "arbitrary"),
        vmem_limit_bytes=_VMEM_LIMIT_BYTES)

    if training:
        kernel = _noisy_linear_train_kernel
        in_specs = [x_spec, w_spec, w_spec,
                    pl.BlockSpec((1, tk), ein_map), row_spec, row_spec]
        args = (x_p, wmu, wsig, ein, eout, bias)
    else:
        kernel = _noisy_linear_eval_kernel
        in_specs = [x_spec, w_spec, row_spec]
        args = (x_p, wmu, bias)

    out_padded = pl.pallas_call(
        kernel,
        out_shape=jax.ShapeDtypeStruct((b_p, out_p), jnp.float32),
        grid_spec=pltpu.PrefetchScalarGridSpec(
            num_scalar_prefetch=0,
            grid=grid,
            in_specs=in_specs,
            out_specs=out_spec,
        ),
        compiler_params=cparams,
        cost_estimate=cost,
    )(*args)

    return out_padded[:batch, :out_features].astype(x.dtype)


def noisy_linear(x, prepared, training=True):
    """Pallas NoisyLinear forward.  `prepared` comes from prepare_noisy_linear()."""
    if training:
        return _noisy_linear_impl(
            x, prepared["weight_mu"], prepared["weight_sigma"],
            prepared["eps_in"], prepared["eps_out"], prepared["bias_noisy"],
            out_features=prepared["out_features"], training=True)
    return _noisy_linear_impl(
        x, prepared["weight_mu"], None, None, None, prepared["bias_mu"],
        out_features=prepared["out_features"], training=False)


# --------------------------------------------------------------------------
# One-time parameter preparation (padding / layout / optional bf16 streaming)
# --------------------------------------------------------------------------

def _pad_to(a, shape):
    if a.shape == shape:
        return a
    widths = [(0, t - s) for s, t in zip(a.shape, shape)]
    return jnp.pad(a, widths)


def prepare_noisy_linear(params, bf16_weights=False):
    """Pad/cast parameters ONCE (outside the hot forward path).

    Re-run only after an optimizer step or reset_noise(); the per-step forward
    never pads or copies the weight arrays.  bf16_weights streams weight_mu /
    weight_sigma as bf16 (f32 accumulation) — ~2x less weight HBM traffic,
    ~1e-2 relative accuracy.
    """
    in_features, out_features = params["weight_mu"].shape
    in_p, out_p = _padded_dims(in_features, out_features)
    w_dtype = jnp.bfloat16 if bf16_weights else jnp.float32

    wmu = _pad_to(params["weight_mu"], (in_p, out_p)).astype(w_dtype)
    wsig = _pad_to(params["weight_sigma"], (in_p, out_p)).astype(w_dtype)
    ein = _pad_to(params["eps_in"].reshape(1, -1), (1, in_p))         # lane-major
    eout = _pad_to(params["eps_out"].reshape(1, -1), (1, out_p))
    bias_mu = _pad_to(params["bias_mu"].reshape(1, -1), (1, out_p))
    bias_noisy = _pad_to(
        (params["bias_mu"] + params["bias_sigma"] * params["eps_out"]
         ).reshape(1, -1), (1, out_p))

    return {
        "weight_mu": wmu, "weight_sigma": wsig,
        "eps_in": ein, "eps_out": eout,
        "bias_mu": bias_mu, "bias_noisy": bias_noisy,
        "in_features": in_features, "out_features": out_features,
    }


# --------------------------------------------------------------------------
# Parameter / noise init (re-implements reset_parameters() + reset_noise())
# --------------------------------------------------------------------------

def _scale_noise(key, size):
    # PyTorch: x = randn(size); x.sign() * x.abs().sqrt()
    x = jax.random.normal(key, (size,), dtype=jnp.float32)
    return jnp.sign(x) * jnp.sqrt(jnp.abs(x))


def init_noisy_linear(key, in_features, out_features, sigma_init=0.017):
    """Weights stored in (in_features, out_features) layout (PyTorch W.T) so the
    kernel's matmul feeds the MXU directly; only the factorised noise vectors
    (eps_in, eps_out) are kept — never the full weight_epsilon."""
    k_wmu, k_bmu, k_ein, k_eout = jax.random.split(key, 4)
    mu_range = 1.0 / math.sqrt(in_features)
    weight_mu = jax.random.uniform(
        k_wmu, (in_features, out_features), jnp.float32, -mu_range, mu_range)
    bias_mu = jax.random.uniform(
        k_bmu, (out_features,), jnp.float32, -mu_range, mu_range)
    weight_sigma = jnp.full((in_features, out_features), sigma_init, jnp.float32)
    bias_sigma = jnp.full((out_features,), sigma_init, jnp.float32)
    eps_in = _scale_noise(k_ein, in_features)      # (in,)
    eps_out = _scale_noise(k_eout, out_features)   # (out,)  == bias_epsilon
    return {
        "weight_mu": weight_mu,
        "bias_mu": bias_mu,
        "weight_sigma": weight_sigma,
        "bias_sigma": bias_sigma,
        "eps_in": eps_in,
        "eps_out": eps_out,
    }


def _reference(x, params, training):
    if training:
        w_eps = params["eps_in"][:, None] * params["eps_out"][None, :]
        w = params["weight_mu"] + params["weight_sigma"] * w_eps
        b = params["bias_mu"] + params["bias_sigma"] * params["eps_out"]
    else:
        w = params["weight_mu"]
        b = params["bias_mu"]
    return x @ w + b


# --------------------------------------------------------------------------
# Demo / self-check
# --------------------------------------------------------------------------

if __name__ == "__main__":
    key = jax.random.PRNGKey(0)
    keys = jax.random.split(key, 6)

    # --- 1) small shapes consistent with the module ---
    batch, in_f, out_f = 2, 32, 64
    params = init_noisy_linear(keys[0], in_f, out_f, sigma_init=0.017)
    prep = prepare_noisy_linear(params)
    x = jax.random.normal(keys[1], (batch, in_f), dtype=jnp.float32)

    y = jax.block_until_ready(noisy_linear(x, prep, training=True))
    assert y.shape == (batch, out_f)
    assert jnp.allclose(y, _reference(x, params, True), atol=1e-4, rtol=1e-4)

    y_eval = jax.block_until_ready(noisy_linear(x, prep, training=False))
    assert jnp.allclose(y_eval, _reference(x, params, False), atol=1e-4, rtol=1e-4)

    # --- 2) multi-batch-block path (weight panels stay resident across batch blocks) ---
    batch2, in2, out2 = 160, 640, 384
    params2 = init_noisy_linear(keys[2], in2, out2)
    prep2 = prepare_noisy_linear(params2)
    x2 = jax.random.normal(keys[3], (batch2, in2), dtype=jnp.float32)

    y2 = jax.block_until_ready(noisy_linear(x2, prep2, training=True))
    assert y2.shape == (batch2, out2)
    assert jnp.allclose(y2, _reference(x2, params2, True), atol=1e-4, rtol=1e-4)

    y2_eval = jax.block_until_ready(noisy_linear(x2, prep2, training=False))
    assert jnp.allclose(y2_eval, _reference(x2, params2, False), atol=1e-4, rtol=1e-4)

    # --- 3) multi-K-step reduction path ---
    batch3, in3, out3 = 4, 2304, 256
    params3 = init_noisy_linear(keys[4], in3, out3)
    prep3 = prepare_noisy_linear(params3)
    x3 = jax.random.normal(keys[5], (batch3, in3), dtype=jnp.float32)

    y3 = jax.block_until_ready(noisy_linear(x3, prep3, training=True))
    assert jnp.allclose(y3, _reference(x3, params3, True), atol=1e-4, rtol=1e-4)

    # --- 4) opt-in bf16 weight streaming (looser tolerance, f32 accumulation) ---
    prep_bf16 = prepare_noisy_linear(params2, bf16_weights=True)
    y_bf16 = jax.block_until_ready(noisy_linear(x2, prep_bf16, training=True))
    assert jnp.allclose(y_bf16, _reference(x2, params2, True), atol=5e-2, rtol=5e-2)

    print("KERNEL_OK")
</pallas_src>

<mosaic_0001>
module attributes {stable_mosaic.version = 11 : i64} {
  func.func @_noisy_linear_train_kernel(%arg0: i32, %arg1: i32, %arg2: i32, %arg3: memref<8x32xf32, #tpu.memory_space<vmem>>, %arg4: memref<32x128xf32, #tpu.memory_space<vmem>>, %arg5: memref<32x128xf32, #tpu.memory_space<vmem>>, %arg6: memref<1x32xf32, #tpu.memory_space<vmem>>, %arg7: memref<1x128xf32, #tpu.memory_space<vmem>>, %arg8: memref<1x128xf32, #tpu.memory_space<vmem>>, %arg9: memref<8x128xf32, #tpu.memory_space<vmem>>) attributes {dimension_semantics = [#tpu.dimension_semantics<parallel>, #tpu.dimension_semantics<parallel>, #tpu.dimension_semantics<arbitrary>], iteration_bounds = array<i64: 1, 1, 1>, scalar_prefetch = 0 : i64, scratch_operands = 0 : i64, tpu.core_type = #tpu.core_type<tc>, window_params = [{transform_indices = @transform_0, window_bounds = array<i64: 8, 32>}, {transform_indices = @transform_1, window_bounds = array<i64: 32, 128>}, {transform_indices = @transform_2, window_bounds = array<i64: 32, 128>}, {transform_indices = @transform_3, window_bounds = array<i64: 1, 32>}, {transform_indices = @transform_4, window_bounds = array<i64: 1, 128>}, {transform_indices = @transform_5, window_bounds = array<i64: 1, 128>}, {transform_indices = @transform_6, window_bounds = array<i64: 8, 128>}]} {
    %c0_i32 = arith.constant 0 : i32
    %0 = arith.cmpi eq, %arg2, %c0_i32 : i32
    %1 = arith.extui %0 : i1 to i32
    %c0_i32_0 = arith.constant 0 : i32
    %2 = arith.cmpi ne, %1, %c0_i32_0 : i32
    scf.if %2 {
      %cst_15 = arith.constant 0.000000e+00 : f32
      %18 = vector.broadcast %cst_15 : f32 to vector<8x128xf32>
      %c0_16 = arith.constant 0 : index
      %c0_17 = arith.constant 0 : index
      %19 = vector.load %arg8[%c0_16, %c0_17] : memref<1x128xf32, #tpu.memory_space<vmem>>, vector<1x128xf32>
      %20 = vector.broadcast %19 : vector<1x128xf32> to vector<8x128xf32>
      %21 = arith.addf %18, %20 : vector<8x128xf32>
      %c0_18 = arith.constant 0 : index
      %c0_19 = arith.constant 0 : index
      %22 = vector.load %arg9[%c0_18, %c0_19] : memref<8x128xf32, #tpu.memory_space<vmem>>, vector<8x128xf32>
      tpu.vector_store %arg9[%c0_18, %c0_19], %21 {strides = array<i32>} : memref<8x128xf32, #tpu.memory_space<vmem>>, vector<8x128xf32>,
    } else {
    }
    %c0 = arith.constant 0 : index
    %c0_1 = arith.constant 0 : index
    %3 = vector.load %arg3[%c0, %c0_1] : memref<8x32xf32, #tpu.memory_space<vmem>>, vector<8x32xf32>
    %c0_2 = arith.constant 0 : index
    %c0_3 = arith.constant 0 : index
    %4 = vector.load %arg4[%c0_2, %c0_3] : memref<32x128xf32, #tpu.memory_space<vmem>>, vector<32x128xf32>
    %c0_4 = arith.constant 0 : index
    %c0_5 = arith.constant 0 : index
    %5 = vector.load %arg5[%c0_4, %c0_5] : memref<32x128xf32, #tpu.memory_space<vmem>>, vector<32x128xf32>
    %c0_6 = arith.constant 0 : index
    %c0_7 = arith.constant 0 : index
    %6 = vector.load %arg6[%c0_6, %c0_7] : memref<1x32xf32, #tpu.memory_space<vmem>>, vector<1x32xf32>
    %7 = vector.broadcast %6 : vector<1x32xf32> to vector<8x32xf32>
    %8 = arith.mulf %3, %7 : vector<8x32xf32>
    %cst = arith.constant dense<0.000000e+00> : vector<8x128xf32>
    %9 = tpu.matmul %3, %4, %cst {dimension_numbers = #tpu.dot_dimension_numbers<[1], [0], [0], [1], [0, 0, 1, 1], [], []>} : vector<8x32xf32>, vector<32x128xf32>, vector<8x128xf32> -> vector<8x128xf32>
    %cst_8 = arith.constant dense<0.000000e+00> : vector<8x128xf32>
    %10 = tpu.matmul %8, %5, %cst_8 {dimension_numbers = #tpu.dot_dimension_numbers<[1], [0], [0], [1], [0, 0, 1, 1], [], []>} : vector<8x32xf32>, vector<32x128xf32>, vector<8x128xf32> -> vector<8x128xf32>
    %c0_9 = arith.constant 0 : index
    %c0_10 = arith.constant 0 : index
    %11 = vector.load %arg7[%c0_9, %c0_10] : memref<1x128xf32, #tpu.memory_space<vmem>>, vector<1x128xf32>
    %12 = vector.broadcast %11 : vector<1x128xf32> to vector<8x128xf32>
    %13 = arith.mulf %10, %12 : vector<8x128xf32>
    %14 = arith.addf %9, %13 : vector<8x128xf32>
    %c0_11 = arith.constant 0 : index
    %c0_12 = arith.constant 0 : index
    %15 = vector.load %arg9[%c0_11, %c0_12] : memref<8x128xf32, #tpu.memory_space<vmem>>, vector<8x128xf32>
    %16 = arith.addf %15, %14 : vector<8x128xf32>
    %c0_13 = arith.constant 0 : index
    %c0_14 = arith.constant 0 : index
    %17 = vector.load %arg9[%c0_13, %c0_14] : memref<8x128xf32, #tpu.memory_space<vmem>>, vector<8x128xf32>
    tpu.vector_store %arg9[%c0_13, %c0_14], %16 {strides = array<i32>} : memref<8x128xf32, #tpu.memory_space<vmem>>, vector<8x128xf32>,
    return
  }
  func.func @transform_0(%arg0: i32, %arg1: i32, %arg2: i32) -> (i32, i32) {
    %c0_i32 = arith.constant 0 : i32
    return %arg0, %arg2 : i32, i32
  }
  func.func @transform_1(%arg0: i32, %arg1: i32, %arg2: i32) -> (i32, i32) {
    %c0_i32 = arith.constant 0 : i32
    return %arg2, %arg1 : i32, i32
  }
  func.func @transform_2(%arg0: i32, %arg1: i32, %arg2: i32) -> (i32, i32) {
    %c0_i32 = arith.constant 0 : i32
    return %arg2, %arg1 : i32, i32
  }
  func.func @transform_3(%arg0: i32, %arg1: i32, %arg2: i32) -> (i32, i32) {
    %c0_i32 = arith.constant 0 : i32
    %c0_i32_0 = arith.constant 0 : i32
    return %c0_i32, %arg2 : i32, i32
  }
  func.func @transform_4(%arg0: i32, %arg1: i32, %arg2: i32) -> (i32, i32) {
    %c0_i32 = arith.constant 0 : i32
    %c0_i32_0 = arith.constant 0 : i32
    return %c0_i32, %arg1 : i32, i32
  }
  func.func @transform_5(%arg0: i32, %arg1: i32, %arg2: i32) -> (i32, i32) {
    %c0_i32 = arith.constant 0 : i32
    %c0_i32_0 = arith.constant 0 : i32
    return %c0_i32, %arg1 : i32, i32
  }
  func.func @transform_6(%arg0: i32, %arg1: i32, %arg2: i32) -> (i32, i32) {
    %c0_i32 = arith.constant 0 : i32
    return %arg0, %arg1 : i32, i32
  }
}

</mosaic_0001>

<bundles_post_ra>
// kernel: _noisy_linear_impl.1
= control target key start
LH: loop header
LB: loop body
LE: loop exit
PB: predicated region body
PF: predicated region fallthrough
CT: control target
= control target key end

     0   :  { %11 = vsyncpa [#allocation3], 0  ;;  %s261_s0 = inlined_call_operand.vmem [shape: f32[8,32], index: 0, kind: input, shape index: {}]   ;;  %s262_s1 = inlined_call_operand.hbm [shape: f32[32,128], index: 1, kind: input, shape index: {}]   ;;  %s263_s2 = inlined_call_operand.hbm [shape: f32[32,128], index: 2, kind: input, shape index: {}]   ;;  %s264_s3 = inlined_call_operand.vmem [shape: f32[1,32], index: 3, kind: input, shape index: {}]   ;;  %s265_s4 = inlined_call_operand.vmem [shape: f32[1,128], index: 4, kind: input, shape index: {}]   ;;  %s266_s5 = inlined_call_operand.vmem [shape: f32[1,128], index: 5, kind: input, shape index: {}]   ;;  %s267_s6 = inlined_call_operand.vmem [shape: f32[8,128], index: 6, kind: output, shape index: {}]  }
   0x1   :  { %s19_s23 = sshll.u32 %s262_s1, 4  ;;  %s20_s23 = int_to_ptr.hbm [resolvable:$true] %s19_s23 }
   0x2   :  { %12 = vsyncpa [#allocation5], 0  ;;  %s201_s24 = smov [#allocation2]   ;;  %s32_s28 = sshll.u32 %s263_s2, 4  ;;  %s33_s28 = int_to_ptr.hbm [resolvable:$true] %s32_s28 }
   0x3   :  { %s21_s25 = sshll.u32 %s201_s24, 4  ;;  %s202_s29 = smov 128   ;;  %s22_s25 = int_to_ptr.vmem [resolvable:$true] %s21_s25 }
   0x4   :  { %s203_s30 = smov 8   ;;  %s204_s7 = smov [#allocation4]  }
   0x5   :  { %27 = dma.hbm_to_vmem [thread:$0]  %s20_s23, 512, %s22_s25, [#allocation3], %s202_s29, %s202_s29, %s203_s30  }
   0x6   :  { %s34_s8 = sshll.u32 %s204_s7, 4  ;;  %s35_s8 = int_to_ptr.vmem [resolvable:$true] %s34_s8 }
   0x7   :  { %40 = dma.hbm_to_vmem [thread:$0]  %s33_s28, 512, %s35_s8, [#allocation5], %s202_s29, %s202_s29, %s203_s30  }
   0x8   :  { %197 = dma.done.wait [#allocation3], 512  }
   0x9   :  { %198 = vsyncadd [#allocation3], 4294966784 }
   0xa   :  { %199 = dma.done.wait [#allocation5], 512  }
   0xb   :  { %200 = vsyncadd [#allocation5], 4294966784  ;;  %v73_v0 = vld [vmem:[#allocation4 + $0x18] sm:$0xff]  ;;  %v72_v1 = vld [vmem:[#allocation4 + $0x10] sm:$0xff]  ;;  %vm79_vm0 = vcmask 261120  }
   0xc   :  { %v69_v2 = vld [vmem:[#allocation2 + $0x18] sm:$0xff]  ;;  %95 = vmatpush.msra.mxu0 %v73_v0  ;;  %v71_v3 = vld [vmem:[#allocation4 + $0x8] sm:$0xff]  ;;  %v68_v4 = vld [vmem:[#allocation2 + $0x10] sm:$0xff] }
   0xd   :  { %123 = vmatpush.msra.mxu1 %v69_v2  ;;  %v67_v5 = vld [vmem:[#allocation2 + $0x8] sm:$0xff]  ;;  %v65_v6 = vld [vmem:[%s261_s0] sm:$0xff] }
   0xe   :  { %96 = vmatpush.msra.mxu0 %v72_v1  ;;  %v146_v7 = vld [vmem:[%s264_s3] ss:$0 sm:$0xff] }
   0xf   :  { %124 = vmatpush.msra.mxu1 %v68_v4  ;;  %v70_v8 = vld [vmem:[#allocation4] sm:$0xff]  ;;  %v78_v10 = vmul.f32 %v146_v7, %v65_v6 }
  0x10   :  { %v66_v9 = vld [vmem:[#allocation2] sm:$0xff]  ;;  %97 = vmatpush.msra.mxu0 %v71_v3 }
  0x11   :  { %125 = vmatpush.msra.mxu1 %v67_v5  ;;  %v147_v11 = vld [vmem:[%s265_s4] ss:$0 sm:$0xff] }
  0x12   :  { %98 = vmatpush.msra.mxu0 %v70_v8  ;;  %v148_v15 = vld [vmem:[%s266_s5] ss:$0 sm:$0xff] }
  0x13   :  { %126 = vmatpush.msra.mxu1 %v66_v9  ;;  %140 = vmatmul.msk.f32.vlgmr.msra.gmra.mxu0 %vm79_vm0, %v78_v10 }
  0x14   :  { %141 = vmatmul.msk.f32.vlgmr.msra.gmra.mxu1 %vm79_vm0, %v65_v6 }
  0x90   :  { %v100_v12 = vpop.f32.mrf.mxu0 }
  0x91   :  { %v128_v13 = vpop.f32.mrf.mxu1  ;;  %v107_v14 = vmul.f32 %v147_v11, %v100_v12 }
  0x93   :  { %v129_v16 = vadd.f32 %v128_v13, %v107_v14 }
  0x95   :  { %v132_v17 = vadd.f32 %v148_v15, %v129_v16 }
  0x97   :  { %133 = vst [vmem:[%s267_s6] sm:$0xff] %v132_v17 }
  0x98   :  { %138 = vsyncpa [#allocation3], 1 }
  0x99   :  { %139 = vsyncpa [#allocation5], 1 }

</bundles_post_ra>
